<compile_context>
chip_gen: v7x
topology: tpu7x:2x2x1
jax: 0.10.0
libtpu: 0.0.40
codegen_flags: <defaults>
</compile_context>

<pallas_src>
import functools

import jax
import jax.numpy as jnp
from jax.experimental import pallas as pl
from jax.experimental.pallas import tpu as pltpu


# ----------------------------------------------------------------------------
# Kernel
# ----------------------------------------------------------------------------
def _ff_kernel(x_ref, w1_ref, b1_ref, w2_ref, b2_ref, o_ref, acc_ref):
    # x_ref:  (tile_m, d_model)
    # w1_ref: (d_model, tile_n)     b1_ref: (1, tile_n)
    # w2_ref: (tile_n, d_model)     b2_ref: (1, d_model)
    # acc_ref: (tile_m, d_model) f32 accumulator, resident across the k axis.
    k = pl.program_id(1)

    # Seed the accumulator with the broadcast output bias so the epilogue is a
    # pure cast+store.
    @pl.when(k == 0)
    def _():
        acc_ref[...] = jnp.broadcast_to(
            b2_ref[...].astype(jnp.float32), acc_ref.shape)

    x = x_ref[...]

    # Linear 1 (this d_inner slab) + bias + ReLU.  Native-dtype MXU operands,
    # f32 accumulation.
    h = jnp.dot(x, w1_ref[...], preferred_element_type=jnp.float32)
    h = jnp.maximum(h + b1_ref[...].astype(jnp.float32), 0.0)
    # (Dropout -> identity in eval mode.)

    # Linear 2 partial product over this d_inner slab, accumulated in f32.
    acc_ref[...] += jnp.dot(h.astype(x.dtype), w2_ref[...],
                            preferred_element_type=jnp.float32)

    @pl.when(k == pl.num_programs(1) - 1)
    def _():
        o_ref[...] = acc_ref[...].astype(o_ref.dtype)
        # (Second Dropout -> identity in eval mode.)


# ----------------------------------------------------------------------------
# Generation-aware sizing helpers (host-side, outside jit)
# ----------------------------------------------------------------------------
def _round_up(x, m):
    return ((x + m - 1) // m) * m


def _hw_config():
    """Per-generation knobs; falls back to safe defaults if queries fail."""
    kind = ""
    try:
        kind = jax.devices()[0].device_kind.lower()
    except Exception:
        pass
    is_v7 = "v7" in kind
    is_v5e = ("v5e" in kind) or ("v5 lite" in kind) or ("v5litepod" in kind)

    vmem_cap = None
    try:
        vmem_cap = int(pltpu.get_tpu_info().vmem_capacity_bytes)
    except Exception:
        vmem_cap = None
    if vmem_cap is None or vmem_cap <= 0:
        vmem_cap = (64 << 20) if is_v7 else (128 << 20)
    if is_v7:
        vmem_cap = min(vmem_cap, 64 << 20)      # per-TC physical VMEM on v7x
    else:
        vmem_cap = min(vmem_cap, 128 << 20)

    return {
        "vmem_cap": vmem_cap,
        "num_tc": 2 if is_v7 else 1,             # v7x: 2 TensorCores / chip
        "lane_align": 128 if is_v5e else 256,    # MXU width (v5e 128, else 256)
        # Streaming-weights tile_m target (clear the HBM machine balance):
        #   v6e ~680 FLOP/B -> 1024 rows; v5e/v7x ~250-310 FLOP/B -> 512 rows.
        "tile_m_stream": 512 if (is_v7 or is_v5e) else 1024,
    }


def _footprint_bytes(tile_m, tile_n, d_model, act_b, w_b):
    """VMEM needed: double-buffered streamed blocks + f32 accumulator."""
    blocks = (tile_m * d_model * act_b           # x block
              + tile_m * d_model * act_b         # out block
              + d_model * tile_n * w_b           # w1 block
              + tile_n * d_model * w_b           # w2 block
              + max(tile_n, 128) * w_b           # b1 block (lane-padded)
              + max(d_model, 128) * w_b)         # b2 block (lane-padded)
    return 2 * blocks + tile_m * d_model * 4     # + acc scratch (f32)


def _pick_tiles(M, d_model, d_inner, act_b, w_b, hw):
    """d_inner must already be a multiple of 128."""
    budget = int(hw["vmem_cap"] * 0.80)          # headroom for compiler scratch
    row_align = 16 if act_b <= 2 else 8          # bf16 packs 16 rows / vreg

    def pick_m(target):
        tm = M if M <= target else (target // row_align) * row_align
        if hw["num_tc"] > 1:
            # Guarantee >= num_tc token tiles so every TensorCore gets work.
            per_core = _round_up(-(-M // hw["num_tc"]), row_align)
            tm = min(tm, per_core)
        return max(tm, 1)

    # --- Weights-resident fast path: collapse the k axis to 1. --------------
    tm_res = pick_m(512)
    if _footprint_bytes(tm_res, d_inner, d_model, act_b, w_b) <= budget:
        return tm_res, d_inner

    # --- Streaming path: slab d_inner, large token tiles. -------------------
    def largest_divisor(align, cap=512):
        best, t = None, align
        while t <= min(cap, d_inner):
            if d_inner % t == 0:
                best = t
            t += align
        return best

    tn = largest_divisor(hw["lane_align"]) or largest_divisor(128) or 128
    tm = pick_m(hw["tile_m_stream"])
    while (_footprint_bytes(tm, tn, d_model, act_b, w_b) > budget
           and tm > row_align):
        tm = max(row_align, ((tm // 2) // row_align) * row_align)
    if _footprint_bytes(tm, tn, d_model, act_b, w_b) > budget:
        tn = 128                                  # last-resort minimum slab
    return tm, tn


# ----------------------------------------------------------------------------
# pallas_call wrapper
# ----------------------------------------------------------------------------
@functools.partial(
    jax.jit,
    static_argnames=("tile_m", "tile_n", "d_inner_pad", "vmem_limit"))
def _positionwise_ff_call(x2d, w1, b1, w2, b2, *, tile_m, tile_n,
                          d_inner_pad, vmem_limit):
    M, d_model = x2d.shape
    d_inner = w1.shape[1]

    # Zero-pad d_inner to a 128-lane multiple (exact: padded hidden units are
    # ReLU(0 + 0) = 0 and contribute 0 through w2's zero rows).
    if d_inner_pad != d_inner:
        pad = d_inner_pad - d_inner
        w1 = jnp.pad(w1, ((0, 0), (0, pad)))
        b1 = jnp.pad(b1, ((0, pad),))
        w2 = jnp.pad(w2, ((0, pad), (0, 0)))

    b1_2d = b1.reshape(1, d_inner_pad)
    b2_2d = b2.reshape(1, d_model)

    m_tiles = pl.cdiv(M, tile_m)
    k_tiles = pl.cdiv(d_inner_pad, tile_n)
    grid = (m_tiles, k_tiles)

    act_b = jnp.dtype(x2d.dtype).itemsize
    w_b = jnp.dtype(w1.dtype).itemsize
    # Weights are read once in the resident path, once per token tile otherwise.
    weight_reads = 1 if k_tiles == 1 else m_tiles
    cost = pl.CostEstimate(
        flops=4 * M * d_model * d_inner_pad,
        transcendentals=0,
        bytes_accessed=(2 * M * d_model * act_b
                        + weight_reads * 2 * d_model * d_inner_pad * w_b
                        + (d_inner_pad + d_model) * w_b))

    return pl.pallas_call(
        _ff_kernel,
        out_shape=jax.ShapeDtypeStruct((M, d_model), x2d.dtype),
        grid_spec=pltpu.PrefetchScalarGridSpec(
            num_scalar_prefetch=0,
            grid=grid,
            in_specs=[
                # token tiles stream over i; weight slabs stream over k
                # (constant block index when k_tiles == 1 -> weights resident).
                pl.BlockSpec((tile_m, d_model), lambda i, k: (i, 0)),
                pl.BlockSpec((d_model, tile_n), lambda i, k: (0, k)),
                pl.BlockSpec((1, tile_n), lambda i, k: (0, k)),
                pl.BlockSpec((tile_n, d_model), lambda i, k: (k, 0)),
                pl.BlockSpec((1, d_model), lambda i, k: (0, 0)),
            ],
            out_specs=pl.BlockSpec((tile_m, d_model), lambda i, k: (i, 0)),
            scratch_shapes=[pltpu.VMEM((tile_m, d_model), jnp.float32)],
        ),
        compiler_params=pltpu.CompilerParams(
            dimension_semantics=("parallel", "arbitrary"),
            vmem_limit_bytes=vmem_limit),
        cost_estimate=cost,
    )(x2d, w1, b1_2d, w2, b2_2d)


def positionwise_ff(inp, w1, b1, w2, b2, *, tile_m=None, tile_n=None):
    """inp: [seq, batch, d_model] -> [seq, batch, d_model] (eval-mode FF)."""
    seq, batch, d_model = inp.shape
    d_inner = w1.shape[1]
    M = seq * batch
    d_inner_pad = _round_up(d_inner, 128)

    hw = _hw_config()
    act_b = jnp.dtype(inp.dtype).itemsize
    w_b = jnp.dtype(w1.dtype).itemsize

    auto_m, auto_n = _pick_tiles(M, d_model, d_inner_pad, act_b, w_b, hw)
    tile_m = auto_m if tile_m is None else min(int(tile_m), M)
    tile_n = auto_n if tile_n is None else min(int(tile_n), d_inner_pad)

    # VMEM request: actual footprint (already double-buffered) + headroom,
    # capped at 80% of physical VMEM for this generation.
    footprint = _footprint_bytes(tile_m, tile_n, d_model, act_b, w_b)
    cap = int(hw["vmem_cap"] * 0.80)
    vmem_limit = int(min(max(footprint + (8 << 20), 32 << 20), cap))

    x2d = inp.reshape(M, d_model)
    out2d = _positionwise_ff_call(
        x2d, w1, b1, w2, b2,
        tile_m=int(tile_m), tile_n=int(tile_n),
        d_inner_pad=int(d_inner_pad), vmem_limit=vmem_limit)
    return out2d.reshape(seq, batch, d_model)


# ----------------------------------------------------------------------------
# Parameter init (mimics nn.Linear default: uniform +-1/sqrt(fan_in))
# ----------------------------------------------------------------------------
def init_params(key, d_model, d_inner, dtype=jnp.float32):
    k1, k2, k3, k4 = jax.random.split(key, 4)
    bound1 = 1.0 / jnp.sqrt(d_model)
    bound2 = 1.0 / jnp.sqrt(d_inner)
    # Stored as [in_features, out_features] so the kernel does x @ W directly.
    w1 = jax.random.uniform(k1, (d_model, d_inner), dtype, -bound1, bound1)
    b1 = jax.random.uniform(k2, (d_inner,), dtype, -bound1, bound1)
    w2 = jax.random.uniform(k3, (d_inner, d_model), dtype, -bound2, bound2)
    b2 = jax.random.uniform(k4, (d_model,), dtype, -bound2, bound2)
    return w1, b1, w2, b2


if __name__ == "__main__":
    key = jax.random.PRNGKey(0)

    d_model, d_inner, seq, batch = 128, 256, 8, 4
    k_inp, k_par = jax.random.split(key)
    inp = jax.random.normal(k_inp, (seq, batch, d_model), jnp.float32)
    w1, b1, w2, b2 = init_params(k_par, d_model, d_inner, jnp.float32)
    ref = jnp.maximum(inp @ w1 + b1, 0.0) @ w2 + b2

    # --- Test 1: f32, explicit small tiles -> exercises the full 2-D grid
    #     (4 token tiles x 2 d_inner slabs) and the accumulator path.
    out = jax.block_until_ready(
        positionwise_ff(inp, w1, b1, w2, b2, tile_m=8, tile_n=128))
    assert out.shape == inp.shape
    assert jnp.allclose(out, ref, atol=5e-3, rtol=5e-3), "f32 (tiled) mismatch"

    # --- Test 2: auto tiling (weights-resident fast path at this size), f32.
    out_auto = jax.block_until_ready(positionwise_ff(inp, w1, b1, w2, b2))
    assert jnp.allclose(out_auto, ref, atol=5e-3, rtol=5e-3), "f32 (auto) mismatch"

    # --- Test 3: bf16 activations/weights, native-dtype MXU path.
    inp_h = inp.astype(jnp.bfloat16)
    w1_h, b1_h = w1.astype(jnp.bfloat16), b1.astype(jnp.bfloat16)
    w2_h, b2_h = w2.astype(jnp.bfloat16), b2.astype(jnp.bfloat16)
    out_h = jax.block_until_ready(
        positionwise_ff(inp_h, w1_h, b1_h, w2_h, b2_h))
    ref_h = (jnp.maximum(inp_h.astype(jnp.float32) @ w1_h.astype(jnp.float32)
                         + b1_h.astype(jnp.float32), 0.0)
             @ w2_h.astype(jnp.float32) + b2_h.astype(jnp.float32))
    assert out_h.shape == inp.shape
    assert jnp.allclose(out_h.astype(jnp.float32), ref_h,
                        atol=1e-1, rtol=1e-1), "bf16 mismatch"

    # --- Test 4: d_inner not a multiple of 128 -> exercises zero-pad path.
    d_inner_odd = 192
    w1o, b1o, w2o, b2o = init_params(jax.random.PRNGKey(1), d_model,
                                     d_inner_odd, jnp.float32)
    out_o = jax.block_until_ready(positionwise_ff(inp, w1o, b1o, w2o, b2o))
    ref_o = jnp.maximum(inp @ w1o + b1o, 0.0) @ w2o + b2o
    assert jnp.allclose(out_o, ref_o, atol=5e-3, rtol=5e-3), \
        "padded-d_inner mismatch"

    print("KERNEL_OK")
</pallas_src>

<mosaic_0001>
module attributes {stable_mosaic.version = 11 : i64} {
  func.func @_ff_kernel(%arg0: i32, %arg1: i32, %arg2: memref<8x128xf32, #tpu.memory_space<vmem>>, %arg3: memref<128x128xf32, #tpu.memory_space<vmem>>, %arg4: memref<1x128xf32, #tpu.memory_space<vmem>>, %arg5: memref<128x128xf32, #tpu.memory_space<vmem>>, %arg6: memref<1x128xf32, #tpu.memory_space<vmem>>, %arg7: memref<8x128xf32, #tpu.memory_space<vmem>>, %arg8: memref<8x128xf32, #tpu.memory_space<vmem>>) attributes {dimension_semantics = [#tpu.dimension_semantics<parallel>, #tpu.dimension_semantics<arbitrary>], iteration_bounds = array<i64: 4, 2>, scalar_prefetch = 0 : i64, scratch_operands = 1 : i64, tpu.core_type = #tpu.core_type<tc>, window_params = [{transform_indices = @transform_0, window_bounds = array<i64: 8, 128>}, {transform_indices = @transform_1, window_bounds = array<i64: 128, 128>}, {transform_indices = @transform_2, window_bounds = array<i64: 1, 128>}, {transform_indices = @transform_3, window_bounds = array<i64: 128, 128>}, {pipeline_mode = #tpu.pipeline_mode<synchronous>, transform_indices = @transform_4, window_bounds = array<i64: 1, 128>}, {transform_indices = @transform_5, window_bounds = array<i64: 8, 128>}]} {
    %c0_i32 = arith.constant 0 : i32
    %0 = arith.cmpi eq, %arg1, %c0_i32 : i32
    %1 = arith.extui %0 : i1 to i32
    %c0_i32_0 = arith.constant 0 : i32
    %2 = arith.cmpi ne, %1, %c0_i32_0 : i32
    scf.if %2 {
      %c0_15 = arith.constant 0 : index
      %c0_16 = arith.constant 0 : index
      %19 = vector.load %arg6[%c0_15, %c0_16] : memref<1x128xf32, #tpu.memory_space<vmem>>, vector<1x128xf32>
      %20 = vector.shape_cast %19 : vector<1x128xf32> to vector<1x128xf32>
      %21 = vector.broadcast %20 : vector<1x128xf32> to vector<8x128xf32>
      %c0_17 = arith.constant 0 : index
      %c0_18 = arith.constant 0 : index
      %22 = vector.load %arg8[%c0_17, %c0_18] : memref<8x128xf32, #tpu.memory_space<vmem>>, vector<8x128xf32>
      tpu.vector_store %arg8[%c0_17, %c0_18], %21 {strides = array<i32>} : memref<8x128xf32, #tpu.memory_space<vmem>>, vector<8x128xf32>,
    } else {
    }
    %c0 = arith.constant 0 : index
    %c0_1 = arith.constant 0 : index
    %3 = vector.load %arg2[%c0, %c0_1] : memref<8x128xf32, #tpu.memory_space<vmem>>, vector<8x128xf32>
    %c0_2 = arith.constant 0 : index
    %c0_3 = arith.constant 0 : index
    %4 = vector.load %arg3[%c0_2, %c0_3] : memref<128x128xf32, #tpu.memory_space<vmem>>, vector<128x128xf32>
    %cst = arith.constant dense<0.000000e+00> : vector<8x128xf32>
    %5 = tpu.matmul %3, %4, %cst {dimension_numbers = #tpu.dot_dimension_numbers<[1], [0], [0], [1], [0, 0, 1, 1], [], []>} : vector<8x128xf32>, vector<128x128xf32>, vector<8x128xf32> -> vector<8x128xf32>
    %c0_4 = arith.constant 0 : index
    %c0_5 = arith.constant 0 : index
    %6 = vector.load %arg4[%c0_4, %c0_5] : memref<1x128xf32, #tpu.memory_space<vmem>>, vector<1x128xf32>
    %7 = vector.broadcast %6 : vector<1x128xf32> to vector<8x128xf32>
    %8 = arith.addf %5, %7 : vector<8x128xf32>
    %cst_6 = arith.constant 0.000000e+00 : f32
    %9 = vector.broadcast %cst_6 : f32 to vector<8x128xf32>
    %10 = arith.maximumf %8, %9 : vector<8x128xf32>
    %c0_7 = arith.constant 0 : index
    %c0_8 = arith.constant 0 : index
    %11 = vector.load %arg8[%c0_7, %c0_8] : memref<8x128xf32, #tpu.memory_space<vmem>>, vector<8x128xf32>
    %c0_9 = arith.constant 0 : index
    %c0_10 = arith.constant 0 : index
    %12 = vector.load %arg5[%c0_9, %c0_10] : memref<128x128xf32, #tpu.memory_space<vmem>>, vector<128x128xf32>
    %cst_11 = arith.constant dense<0.000000e+00> : vector<8x128xf32>
    %13 = tpu.matmul %10, %12, %cst_11 {dimension_numbers = #tpu.dot_dimension_numbers<[1], [0], [0], [1], [0, 0, 1, 1], [], []>} : vector<8x128xf32>, vector<128x128xf32>, vector<8x128xf32> -> vector<8x128xf32>
    %14 = arith.addf %11, %13 : vector<8x128xf32>
    %c0_12 = arith.constant 0 : index
    %c0_13 = arith.constant 0 : index
    %15 = vector.load %arg8[%c0_12, %c0_13] : memref<8x128xf32, #tpu.memory_space<vmem>>, vector<8x128xf32>
    tpu.vector_store %arg8[%c0_12, %c0_13], %14 {strides = array<i32>} : memref<8x128xf32, #tpu.memory_space<vmem>>, vector<8x128xf32>,
    %c1_i32 = arith.constant 1 : i32
    %16 = arith.cmpi eq, %arg1, %c1_i32 : i32
    %17 = arith.extui %16 : i1 to i32
    %c0_i32_14 = arith.constant 0 : i32
    %18 = arith.cmpi ne, %17, %c0_i32_14 : i32
    scf.if %18 {
      %c0_15 = arith.constant 0 : index
      %c0_16 = arith.constant 0 : index
      %19 = vector.load %arg8[%c0_15, %c0_16] : memref<8x128xf32, #tpu.memory_space<vmem>>, vector<8x128xf32>
      %c0_17 = arith.constant 0 : index
      %c0_18 = arith.constant 0 : index
      %20 = vector.load %arg7[%c0_17, %c0_18] : memref<8x128xf32, #tpu.memory_space<vmem>>, vector<8x128xf32>
      tpu.vector_store %arg7[%c0_17, %c0_18], %19 {strides = array<i32>} : memref<8x128xf32, #tpu.memory_space<vmem>>, vector<8x128xf32>,
    } else {
    }
    return
  }
  func.func @transform_0(%arg0: i32, %arg1: i32) -> (i32, i32) {
    %c0_i32 = arith.constant 0 : i32
    %c0_i32_0 = arith.constant 0 : i32
    return %arg0, %c0_i32 : i32, i32
  }
  func.func @transform_1(%arg0: i32, %arg1: i32) -> (i32, i32) {
    %c0_i32 = arith.constant 0 : i32
    %c0_i32_0 = arith.constant 0 : i32
    return %c0_i32, %arg1 : i32, i32
  }
  func.func @transform_2(%arg0: i32, %arg1: i32) -> (i32, i32) {
    %c0_i32 = arith.constant 0 : i32
    %c0_i32_0 = arith.constant 0 : i32
    return %c0_i32, %arg1 : i32, i32
  }
  func.func @transform_3(%arg0: i32, %arg1: i32) -> (i32, i32) {
    %c0_i32 = arith.constant 0 : i32
    %c0_i32_0 = arith.constant 0 : i32
    return %arg1, %c0_i32 : i32, i32
  }
  func.func @transform_4(%arg0: i32, %arg1: i32) -> (i32, i32) {
    %c0_i32 = arith.constant 0 : i32
    %c0_i32_0 = arith.constant 0 : i32
    %c0_i32_1 = arith.constant 0 : i32
    return %c0_i32, %c0_i32_0 : i32, i32
  }
  func.func @transform_5(%arg0: i32, %arg1: i32) -> (i32, i32) {
    %c0_i32 = arith.constant 0 : i32
    %c0_i32_0 = arith.constant 0 : i32
    return %arg0, %c0_i32 : i32, i32
  }
}

</mosaic_0001>

<bundles_post_ra>
// kernel: _positionwise_ff_call.1
= control target key start
LH: loop header
LB: loop body
LE: loop exit
PB: predicated region body
PF: predicated region fallthrough
CT: control target
= control target key end

     0   :  { %s1661_s0 = inlined_call_operand.hbm [shape: f32[32,128], index: 0, kind: input, shape index: {}]   ;;  %s1662_s1 = inlined_call_operand.hbm [shape: f32[128,256], index: 1, kind: input, shape index: {}]   ;;  %s1663_s2 = inlined_call_operand.vmem [shape: f32[1,256], index: 2, kind: input, shape index: {}]   ;;  %s1664_s3 = inlined_call_operand.hbm [shape: f32[256,128], index: 3, kind: input, shape index: {}]   ;;  %s1665_s4 = inlined_call_operand.vmem [shape: f32[1,128], index: 4, kind: input, shape index: {}]   ;;  %s1666_s5 = inlined_call_operand.hbm [shape: f32[32,128], index: 5, kind: output, shape index: {}]  }
   0x1   :  { %1679 = sst [smem:[#allocation20_spill]] %s1662_s1 }
   0x2   :  { %1680 = sst [smem:[#allocation21_spill]] %s1663_s2 }
   0x3   :  { %1681 = sst [smem:[#allocation22_spill]] %s1665_s4 }
   0x4   :  { %1682 = sst [smem:[#allocation23_spill]] %s1666_s5 }
   0x5   :  { %10 = vsyncpa [#allocation4], 0 }
   0x6   :  { %12 = vsyncpa [#allocation4 + $0x1], 0 }
   0x7   :  { %13 = vsyncpa [#allocation7], 0 }
   0x8   :  { %15 = vsyncpa [#allocation7 + $0x1], 0 }
   0x9   :  { %16 = vsyncpa [#allocation5], 0 }
   0xa   :  { %18 = vsyncpa [#allocation5 + $0x1], 0  ;;  %s1245_s18 = smov 0   ;;  %s1247_s19 = smov 0  }
   0xb   :  { %s1249_s20 = smov 0   ;;  %s1251_s21 = smov 0  }
   0xc   :  { %s1253_s22 = smov 0   ;;  %s1255_s23 = smov 0  }
   0xd   :  { %s1257_s24 = smov 0   ;;  %s1259_s25 = smov 0  }
   0xe   :  { %s1261_s26 = smov 0   ;;  %s1263_s27 = smov 0  }
   0xf   :  { %s1265_s28 = smov 0  }
  0x10 LB: > { %1683 = sst [smem:[#allocation13_spill]] %s1183_s23  ;;  %p51_p0 = scmp.eq.s32.totalorder %s1203_s28, 0  ;;  %s1203_s28 = sphi %s1265_s28, %s24_s28   ;;  %s1199_s27 = sphi %s1263_s27, %s1720_s27   ;;  %s1195_s26 = sphi %s1261_s26, %s1727_s26   ;;  %s1191_s25 = sphi %s1259_s25, %s1718_s25   ;;  %s1187_s24 = sphi %s1257_s24, %s1726_s24   ;;  %s1183_s23 = sphi %s1255_s23, %s1717_s23   ;;  %s1179_s22 = sphi %s1253_s22, %s1725_s22   ;;  %s1175_s21 = sphi %s1251_s21, %s1724_s21   ;;  %s1171_s20 = sphi %s1249_s20, %s1723_s20   ;;  %s1167_s19 = sphi %s1247_s19, %s1722_s19   ;;  %s1163_s18 = sphi %s1245_s18, %s1721_s18  }
  0x11   : > { %1684 = sst [smem:[#allocation14_spill]] %s1191_s25  ;;  %p76_p1 = scmp.ne.s32.totalorder %s1171_s20, %s1167_s19 }
  0x12   : > { %1685 = sst [smem:[#allocation15_spill]] %s1199_s27  ;;  %p1667_p2 = scmp.lt.s32.totalorder %s1203_s28, 8 }
  0x13   : > { %s226_s30 = sand.u32 1, %s1203_s28   ;;  %p78_p3 = por %p76_p1, %p51_p0 }
  0x14   : > { %s228_s6 = sand.u32 1, %s1171_s20   ;;  %s699_s7 = sshll.u32 %s1195_s26, 7 }
  0x15   : > { %s1310_s8 = sshll.u32 %s228_s6, 7  ;;  %s1686_s1 = sld [smem:[#allocation20_spill]] }
  0x16   : > { %p1319_p4 = pnand %p1667_p2, %p78_p3  ;;  %s230_s13 = scalar_lea.vmem [#allocation6], %s1310_s8 }
  0x17   : > { %s236_s14 = sshll.u32 %s230_s13, 4  ;;  %s1326_s15 = scalar_lea.sflag [#allocation7], %s226_s30  ;;  %s1324_s14 = int_to_ptr.vmem [resolvable:$true] %s236_s14 }
  0x18   : > { %p1672_p6 = pneg %p1319_p4 }
  0x1b   : > { %s1315_s11 = scalar_lea.hbm %s1686_s1, %s699_s7  ;;  %s992_s7 = scalar_lea.hbm %s1686_s1, 4096 }
  0x1c   : > { %s987_s16 = scalar_lea.hbm %s1315_s11, 2048  ;;  %p993_p9 = scmp.lt.u32.totalorder %s1315_s11, %s1686_s1 }
  0x1d   : > { %p988_p5 = scmp.ne.s32.totalorder %s1315_s11, %s987_s16  ;;  %p994_p10 = scmp.lt.u32.totalorder %s992_s7, %s987_s16 }
  0x1e   : > { %p996_p12 = scmp.lt.u32.totalorder %s987_s16, %s1315_s11 }
  0x1f   : > { %p990_p7 = pnand %p1672_p6, %p988_p5  ;;  %p995_p11 = por %p994_p10, %p993_p9 }
  0x21   : > { %p991_p8 = pneg %p990_p7  ;;  %p997_p13 = por %p996_p12, %p995_p11 }
  0x23   : > { %p998_p1 = pnand %p997_p13, %p991_p8 }
  0x25   : > { %1001 = shalt.err (!%p998_p1)
}
  0x26   : > { %s1002_s30 = scalar_lea.vmem %s1324_s14, 2048  ;;  %s1205_s13 = smov [#allocation6]  }
  0x27   : > { %p1003_p3 = scmp.ne.s32.totalorder %s1324_s14, %s1002_s30  ;;  %s1007_s17 = sshll.u32 %s1205_s13, 4  ;;  %s1008_s17 = int_to_ptr.vmem [resolvable:$false] %s1007_s17 }
  0x28   : > { %s1009_s6 = scalar_lea.vmem %s1008_s17, 4096  ;;  %p1010_p2 = scmp.lt.s32.totalorder %s1324_s14, %s1008_s17 }
  0x29   : > { %p1005_p5 = pnand %p1003_p3, %p1672_p6  ;;  %p1011_p9 = scmp.lt.s32.totalorder %s1009_s6, %s1002_s30 }
  0x2b   : > { %p1006_p7 = pneg %p1005_p5  ;;  %p1012_p10 = por %p1011_p9, %p1010_p2 }
  0x2d   : > { %p1013_p11 = pnand %p1012_p10, %p1006_p7 }
  0x2f   : > { %1016 = shalt.err (!%p1013_p11)
}
  0x30   : > { %s1206_s16 = smov 256   ;;  %s1668_s7 = smov 128  }
  0x31   : > { %s1669_s9 = smov 8   ;;  %p703_p2 = scmp.ge.s32.totalorder %s1203_s28, 1 }
  0x32   : > { %883 = dma.hbm_to_vmem [thread:$0]  (!%p1319_p4), %s1315_s11, 2048, %s1324_s14, %s1326_s15, %s1206_s16, %s1668_s7, %s1669_s9  }
  0x33   : > { %p271_p8 = scmp.lt.s32.totalorder %s1203_s28, 9  ;;  %s1363_s30 = sadd.s32 4294967295, %s1203_s28  }
  0x34   : > { %s693_s13 = sadd.s32 4294967294, %s1203_s28   ;;  %s33_s17 = sadd.s32 1, %s1195_s26 }
  0x35   : > { %p1358_p12 = pnand %p703_p2, %p271_p8  ;;  %p34_p13 = scmp.ge.s32.totalorder %s33_s17, 2 }
  0x36   : > { %s36_s6 = sadd.s32 1, %s1199_s27  ;;  %s43_s11 = sadd.s32 1, %s1183_s23 }
  0x37   : > { %s1688_s10 = scalar_select %p1358_p12, 1, 0 }
  0x38   : > { %p50_p1 = scmp.ne.s32.totalorder %s1183_s23, %s1179_s22  ;;  %s1729_s17 = smov (%p34_p13, %s33_s17), 0 }
  0x39   : > { %1689 = sst [smem:[#allocation16_spill]] %s1729_s17  ;;  %s1731_s6 = smov (!%p34_p13, %s36_s6), %s1199_s27 }
  0x3a   : > { %p1379_p3 = por %p51_p0, %p50_p1  ;;  %p56_p5 = scmp.ne.s32.totalorder %s1179_s22, %s1175_s21 }
  0x3b   : > { %p38_p7 = scmp.ge.s32.totalorder %s1731_s6, 4  ;;  %p57_p9 = scmp.eq.s32.totalorder %s1363_s30, 0 }
  0x3c   : > { %s66_s16 = ssub.s32 %s1195_s26, %s1729_s17  ;;  %p82_p10 = scmp.ne.s32.totalorder %s1167_s19, %s1163_s18 }
  0x3d   : > { %s1733_s6 = smov (%p38_p7, %s1731_s6), 0  ;;  %p1395_p11 = por %p57_p9, %p56_p5 }
  0x3e   : > { %1691 = sst [smem:[#allocation17_spill]] %s1733_s6  ;;  %p67_p0 = scmp.eq.s32.totalorder %s66_s16, 0 }
  0x3f   : > { %s1692_s7 = scalar_select %p1395_p11, 1, 0 }
  0x40   : > { %s40_s9 = ssub.s32 %s1199_s27, %s1733_s6  ;;  %p1401_p2 = por %p82_p10, %p57_p9 }
  0x41   : > { %p41_p8 = scmp.eq.s32.totalorder %s40_s9, 0  ;;  %p179_p13 = scmp.eq.s32.totalorder %s1363_s30, 7 }
  0x42   : > { %s1693_s29 = scalar_select %p1401_p2, 1, 0 }
  0x43   : > { %s1694_s1 = sadd.s32 1, %s1171_s20  ;;  %p1417_p7 = por %p179_p13, %p50_p1 }
  0x44   : > { %s1409_s18 = scalar_select %p67_p0, %s1171_s20, %s1694_s1  }
  0x45   : > { %s1412_s17 = scalar_select %p41_p8, %s1183_s23, %s43_s11  }
  0x46   : > { %1695 = sst [smem:[#allocation18_spill]] %s1409_s18  ;;  %p185_p6 = scmp.eq.s32.totalorder %s693_s13, 7 }
  0x47   : > { %1696 = sst [smem:[#allocation19_spill]] %s1412_s17  ;;  %s208_s25 = sand.u32 1, %s1183_s23  }
  0x48   : > { %s1697_s5 = scalar_select %p1417_p7, 1, 0 }
  0x49   : > { %s697_s16 = sshll.u32 %s1199_s27, 7  ;;  %p1426_p9 = por %p185_p6, %p56_p5 }
  0x4a   : > { %s696_s9 = sshll.u32 %s208_s25, 3  ;;  %s1433_s1 = scalar_lea.hbm %s1661_s0, %s697_s16 }
  0x4b   : > { %s1698_s6 = scalar_select %p1426_p9, 1, 0 }
  0x4c   : > { %p1699_p10 = scmp.lt.s32.totalorder %s1203_s28, 8  ;;  %s212_s11 = scalar_lea.vmem [#allocation3], %s696_s9 }
  0x4d   : > { %s219_s27 = sshll.u32 %s212_s11, 4  ;;  %s209_s17 = scalar_lea.sflag [#allocation4], %s208_s25  ;;  %s1443_s27 = int_to_ptr.vmem [resolvable:$true] %s219_s27 }
  0x4e   : > { %p1439_p1 = pnand %p1699_p10, %p1379_p3  ;;  %s1017_s2 = scalar_lea.hbm %s1433_s1, 128 }
  0x4f   : > { %p1018_p6 = scmp.ne.s32.totalorder %s1433_s1, %s1017_s2  ;;  %s1022_s16 = scalar_lea.hbm %s1661_s0, 512 }
  0x50   : > { %p1019_p5 = pneg %p1439_p1  ;;  %p1023_p3 = scmp.lt.u32.totalorder %s1433_s1, %s1661_s0 }
  0x51   : > { %p1024_p13 = scmp.lt.u32.totalorder %s1022_s16, %s1017_s2  ;;  %p1026_p9 = scmp.lt.u32.totalorder %s1017_s2, %s1433_s1 }
  0x52   : > { %p1020_p0 = pnand %p1019_p5, %p1018_p6 }
  0x53   : > { %p1025_p10 = por %p1024_p13, %p1023_p3 }
  0x54   : > { %p1021_p8 = pneg %p1020_p0 }
  0x55   : > { %p1027_p7 = por %p1026_p9, %p1025_p10 }
  0x57   : > { %p1028_p2 = pnand %p1027_p7, %p1021_p8 }
  0x59   : > { %1031 = shalt.err (!%p1028_p2)
}
  0x5a   : > { %s1032_s25 = scalar_lea.vmem %s1443_s27, 128  ;;  %s1209_s9 = smov [#allocation3]  }
  0x5b   : > { %p1033_p6 = scmp.ne.s32.totalorder %s1443_s27, %s1032_s25  ;;  %s1037_s11 = sshll.u32 %s1209_s9, 4  ;;  %s1038_s11 = int_to_ptr.vmem [resolvable:$false] %s1037_s11 }
  0x5c   : > { %s1039_s23 = scalar_lea.vmem %s1038_s11, 256  ;;  %p1040_p12 = scmp.lt.s32.totalorder %s1443_s27, %s1038_s11 }
  0x5d   : > { %p1035_p0 = pnand %p1033_p6, %p1019_p5  ;;  %p1041_p3 = scmp.lt.s32.totalorder %s1039_s23, %s1032_s25 }
  0x5f   : > { %p1036_p11 = pneg %p1035_p0  ;;  %p1042_p13 = por %p1041_p3, %p1040_p12 }
  0x61   : > { %p1043_p9 = pnand %p1042_p13, %p1036_p11 }
  0x63   : > { %1046 = shalt.err (!%p1043_p9)
}
  0x64   : > { %880 = dma.hbm_to_vmem [thread:$0]  (!%p1439_p1), %s1433_s1, 128, %s1443_s27, %s209_s17  }
  0x65   : > { %s716_s18 = sshll.u32 %s1195_s26, 11  ;;  %s256_s2 = scalar_lea.vmem [#allocation8], %s1310_s8 }
  0x66   : > { %s263_s4 = sshll.u32 %s256_s2, 4  ;;  %s1475_s9 = scalar_lea.hbm %s1664_s3, %s716_s18  ;;  %s1477_s4 = int_to_ptr.vmem [resolvable:$true] %s263_s4 }
  0x67   : > { %s1047_s13 = scalar_lea.hbm %s1475_s9, 2048  ;;  %p1701_p11 = pneg %p1319_p4 }
  0x68   : > { %p1048_p12 = scmp.ne.s32.totalorder %s1475_s9, %s1047_s13  ;;  %s1052_s17 = scalar_lea.hbm %s1664_s3, 4096 }
  0x69   : > { %p1053_p1 = scmp.lt.u32.totalorder %s1475_s9, %s1664_s3  ;;  %p1054_p5 = scmp.lt.u32.totalorder %s1052_s17, %s1047_s13 }
  0x6a   : > { %p1050_p2 = pnand %p1048_p12, %p1701_p11  ;;  %p1056_p10 = scmp.lt.u32.totalorder %s1047_s13, %s1475_s9 }
  0x6b   : > { %p1055_p8 = por %p1054_p5, %p1053_p1 }
  0x6c   : > { %p1051_p7 = pneg %p1050_p2 }
  0x6d   : > { %p1057_p6 = por %p1056_p10, %p1055_p8 }
  0x6f   : > { %p1058_p0 = pnand %p1057_p6, %p1051_p7 }
  0x71   : > { %1061 = shalt.err (!%p1058_p0)
}
  0x72   : > { %s1062_s11 = scalar_lea.vmem %s1477_s4, 2048  ;;  %p1702_p13 = pmov %p1701_p11 }
  0x73   : > { %p1063_p3 = scmp.ne.s32.totalorder %s1477_s4, %s1062_s11  ;;  %s1210_s23 = smov [#allocation8]  }
  0x74   : > { %s1067_s18 = sshll.u32 %s1210_s23, 4  ;;  %s1068_s18 = int_to_ptr.vmem [resolvable:$false] %s1067_s18 }
  0x75   : > { %p1065_p9 = pnand %p1063_p3, %p1702_p13  ;;  %s1069_s2 = scalar_lea.vmem %s1068_s18, 4096 }
  0x76   : > { %p1070_p11 = scmp.lt.s32.totalorder %s1477_s4, %s1068_s18  ;;  %p1071_p2 = scmp.lt.s32.totalorder %s1069_s2, %s1062_s11 }
  0x77   : > { %p1066_p12 = pneg %p1065_p9 }
  0x78   : > { %p1072_p1 = por %p1071_p2, %p1070_p11 }
  0x7a   : > { %p1073_p5 = pnand %p1072_p1, %p1066_p12 }
  0x7c   : > { %1076 = shalt.err (!%p1073_p5)
}
  0x7d   : > { %s1703_s14 = smov 8   ;;  %s1704_s16 = smov 128  }
  0x7e   : > { %886 = dma.hbm_to_vmem [thread:$0]  (!%p1319_p4), %s1475_s9, 2048, %s1477_s4, %s1326_s15, %s1704_s16, %s1704_s16, %s1703_s14  }
  0x7f   : > { %p1705_p7 = scmp.ne.s32.totalorder %s1688_s10, 0 }
  0x80   : > { %s1509_s13 = sand.u32 (!%p1705_p7), 1, %s1179_s22   ;;  %p1706_p8 = scmp.ne.s32.totalorder (!%p1705_p7), %s1692_s7, 0 }
  0x81   : > { %275 = sbr.rel (%p1705_p7) target bundleno = 654 (0x28e), region = 40  ;;  %s704_s27 = sshll.u32 (!%p1705_p7), %s1509_s13, 3 }
  0x82   : > { %s278_s8 = scalar_lea.sflag (!%p1705_p7), [#allocation4], %s1509_s13  ;;  %s1513_s17 = scalar_lea.vmem (!%p1705_p7), [#allocation3], %s704_s27 }
  0x88   : > { %1150 = dma.done.wait (%p1706_p8), %s278_s8, 128  }
  0x89   : > { %1152 = vsyncadd (%p1706_p8), %s278_s8, 4294967168  ;;  %s286_s12 = sand.u32 1, %s1363_s30   ;;  %s288_s15 = sand.u32 1, %s1167_s19  }
  0x8a   : > { %s705_s10 = sshll.u32 %s288_s15, 7  ;;  %s287_s4 = scalar_lea.sflag [#allocation7], %s286_s12 }
  0x8b   : > { %s1521_s9 = scalar_lea.vmem [#allocation6], %s705_s10  ;;  %p1707_p4 = scmp.ne.s32.totalorder %s1693_s29, 0 }
  0x8d   : > { %1154 = dma.done.wait (%p1707_p4), %s287_s4, 4096  }
  0x8e   : > { %1156 = vsyncadd (%p1707_p4), %s287_s4, 4294963200  ;;  %p339_p10 = scmp.lt.s32.totalorder %s1187_s24, 1  ;;  %s1708_s11 = sld [smem:[#allocation21_spill]] }
  0x8f   : > { %s1535_s23 = scalar_lea.vmem [#allocation8], %s705_s10  ;;  %s1537_s18 = scalar_lea.vmem [#allocation9], %s704_s27 }
  0x90   : > { %s1529_s1 = scalar_select %p339_p10, %s1187_s24, 1 }
  0x91   : > { %p708_p6 = scmp.ne.s32.totalorder %s1187_s24, 0 }
  0x92   : > { %s1709_s14 = sld [smem:[#allocation22_spill]] (!%p708_p6) }
  0x93   : > { %346 = sbr.rel (%p708_p6) target bundleno = 154 (0x9a), region = 56 }
  0x94   : > { %s341_s30 = scalar_lea.vmem %s1708_s11, %s1529_s1 }
  0x98   : > { %v709_v0 = vld [vmem:[%s1709_s14] ss:$0 sm:$0xff] (!%p708_p6) }
  0x99   : > { %354 = vst [vmem:[#allocation2] sm:$0xff] (!%p708_p6), %v709_v0 }
  0x9a PF: > { %v356_v1 = vld [vmem:[%s1521_s9] sm:$0xff]  ;;  %v357_v2 = vld [vmem:[%s1521_s9 + $0x8] sm:$0xff]  ;;  %v358_v3 = vld [vmem:[%s1521_s9 + $0x10] sm:$0xff]  ;;  %v1211_v4 = vmov 0.0|0.0   ;;  %vm1212_vm0 = vmmov 0   ;;  %v1213_v7 = vmov 0.0  }
  0x9b   : > { %821 = vmatprep.subr.bf16.mxu0 %v1211_v4  ;;  %v822_v5 = vpack.c.bf16 %v357_v2, %v356_v1  ;;  %v359_v6 = vld [vmem:[%s1521_s9 + $0x18] sm:$0xff]  ;;  %783 = vmatprep.mubr.msk.f32.mxu0 %vm1212_vm0, %v1213_v7  ;;  %v360_v9 = vld [vmem:[%s1521_s9 + $0x20] sm:$0xff]  ;;  %v361_v10 = vld [vmem:[%s1521_s9 + $0x28] sm:$0xff]  ;;  %p711_p0 = scmp.ne.s32.totalorder %s1187_s24, 1 }
  0x9c   : > { %845 = vmatprep.subr.bf16.mxu1 %v1211_v4  ;;  %818 = vmatprep.mubr.msk.f32.mxu1 %vm1212_vm0, %v1213_v7  ;;  %v825_v8 = vpack.c.bf16 %v359_v6, %v358_v3  ;;  %v451_v11 = vld [vmem:[%s1535_s23] sm:$0xff]  ;;  %v452_v12 = vld [vmem:[%s1535_s23 + $0x8] sm:$0xff]  ;;  %v453_v13 = vld [vmem:[%s1535_s23 + $0x10] sm:$0xff]  ;;  %v828_v15 = vpack.c.bf16 %v361_v10, %v360_v9 }
  0x9d   : > { %823 = vmatpush3.bf16.msra.mxu0 %v822_v5  ;;  %v454_v14 = vld [vmem:[%s1535_s23 + $0x18] sm:$0xff]  ;;  %v846_v16 = vpack.c.bf16 %v452_v12, %v451_v11  ;;  %v362_v17 = vld [vmem:[%s1521_s9 + $0x30] sm:$0xff]  ;;  %v455_v20 = vld [vmem:[%s1535_s23 + $0x20] sm:$0xff] }
  0x9e   : > { %824 = vmatprep.subr.bf16.mxu0 %v1211_v4  ;;  %v363_v18 = vld [vmem:[%s1521_s9 + $0x38] sm:$0xff]  ;;  %v849_v19 = vpack.c.bf16 %v454_v14, %v453_v13  ;;  %v456_v21 = vld [vmem:[%s1535_s23 + $0x28] sm:$0xff]  ;;  %v364_v23 = vld [vmem:[%s1521_s9 + $0x40] sm:$0xff] }
  0x9f   : > { %847 = vmatpush3.bf16.msra.mxu1 %v846_v16  ;;  %v831_v22 = vpack.c.bf16 %v363_v18, %v362_v17  ;;  %v365_v24 = vld [vmem:[%s1521_s9 + $0x48] sm:$0xff]  ;;  %v852_v25 = vpack.c.bf16 %v456_v21, %v455_v20  ;;  %v457_v26 = vld [vmem:[%s1535_s23 + $0x30] sm:$0xff]  ;;  %v458_v27 = vld [vmem:[%s1535_s23 + $0x38] sm:$0xff] }
  0xa0   : > { %848 = vmatprep.subr.bf16.mxu1 %v1211_v4  ;;  %v834_v28 = vpack.c.bf16 %v365_v24, %v364_v23  ;;  %v366_v29 = vld [vmem:[%s1521_s9 + $0x50] sm:$0xff]  ;;  %v367_v30 = vld [vmem:[%s1521_s9 + $0x58] sm:$0xff]  ;;  %v855_v31 = vpack.c.bf16 %v458_v27, %v457_v26  ;;  %v459_v32 = vld [vmem:[%s1535_s23 + $0x40] sm:$0xff] }
  0xa1   : > { %826 = vmatpush3.bf16.msra.mxu0 %v825_v8  ;;  %v460_v33 = vld [vmem:[%s1535_s23 + $0x48] sm:$0xff]  ;;  %v837_v34 = vpack.c.bf16 %v367_v30, %v366_v29  ;;  %v368_v35 = vld [vmem:[%s1521_s9 + $0x60] sm:$0xff]  ;;  %v461_v38 = vld [vmem:[%s1535_s23 + $0x50] sm:$0xff] }
  0xa2   : > { %827 = vmatprep.subr.bf16.mxu0 %v1211_v4  ;;  %v369_v36 = vld [vmem:[%s1521_s9 + $0x68] sm:$0xff]  ;;  %v858_v37 = vpack.c.bf16 %v460_v33, %v459_v32  ;;  %v462_v39 = vld [vmem:[%s1535_s23 + $0x58] sm:$0xff]  ;;  %v370_v41 = vld [vmem:[%s1521_s9 + $0x70] sm:$0xff] }
  0xa3   : > { %850 = vmatpush3.bf16.msra.mxu1 %v849_v19  ;;  %v840_v40 = vpack.c.bf16 %v369_v36, %v368_v35  ;;  %v371_v42 = vld [vmem:[%s1521_s9 + $0x78] sm:$0xff]  ;;  %v861_v43 = vpack.c.bf16 %v462_v39, %v461_v38  ;;  %v463_v44 = vld [vmem:[%s1535_s23 + $0x60] sm:$0xff]  ;;  %v464_v45 = vld [vmem:[%s1535_s23 + $0x68] sm:$0xff] }
  0xa4   : > { %851 = vmatprep.subr.bf16.mxu1 %v1211_v4  ;;  %v843_v46 = vpack.c.bf16 %v371_v42, %v370_v41  ;;  %v864_v47 = vpack.c.bf16 %v464_v45, %v463_v44  ;;  %v355_v48 = vld [vmem:[%s1513_s17] sm:$0xff]  ;;  %v710_v52 = vld [vmem:[%s341_s30] ss:$0 sm:$0xff] }
  0xa5   : > { %829 = vmatpush3.bf16.msra.mxu0 %v828_v15  ;;  %v465_v49 = vld [vmem:[%s1535_s23 + $0x70] sm:$0xff]  ;;  %v466_v50 = vld [vmem:[%s1535_s23 + $0x78] sm:$0xff]  ;;  %v450_v57 = vld [vmem:[#allocation2] sm:$0xff] }
  0xa6   : > { %830 = vmatprep.subr.bf16.mxu0 %v1211_v4  ;;  %v867_v51 = vpack.c.bf16 %v466_v50, %v465_v49 }
  0xa7   : > { %853 = vmatpush3.bf16.msra.mxu1 %v852_v25 }
  0xa8   : > { %854 = vmatprep.subr.bf16.mxu1 %v1211_v4 }
  0xa9   : > { %832 = vmatpush3.bf16.msra.mxu0 %v831_v22 }
  0xaa   : > { %833 = vmatprep.subr.bf16.mxu0 %v1211_v4 }
  0xab   : > { %856 = vmatpush3.bf16.msra.mxu1 %v855_v31 }
  0xac   : > { %857 = vmatprep.subr.bf16.mxu1 %v1211_v4 }
  0xad   : > { %835 = vmatpush3.bf16.msra.mxu0 %v834_v28 }
  0xae   : > { %836 = vmatprep.subr.bf16.mxu0 %v1211_v4 }
  0xaf   : > { %859 = vmatpush3.bf16.msra.mxu1 %v858_v37 }
  0xb0   : > { %860 = vmatprep.subr.bf16.mxu1 %v1211_v4 }
  0xb1   : > { %838 = vmatpush3.bf16.msra.mxu0 %v837_v34 }
  0xb2   : > { %839 = vmatprep.subr.bf16.mxu0 %v1211_v4 }
  0xb3   : > { %862 = vmatpush3.bf16.msra.mxu1 %v861_v43 }
  0xb4   : > { %863 = vmatprep.subr.bf16.mxu1 %v1211_v4 }
  0xb5   : > { %841 = vmatpush3.bf16.msra.mxu0 %v840_v40 }
  0xb6   : > { %842 = vmatprep.subr.bf16.mxu0 %v1211_v4 }
  0xb7   : > { %865 = vmatpush3.bf16.msra.mxu1 %v864_v47 }
  0xb8   : > { %866 = vmatprep.subr.bf16.mxu1 %v1211_v4 }
  0xb9   : > { %844 = vmatpush3.bf16.msra.mxu0 %v843_v46 }
  0xbb   : > { %868 = vmatpush3.bf16.msra.mxu1 %v867_v51 }
  0xbc   : > { %784 = vmatmul.mubr.f32.vlgmr.msra.gmra.mrb[0].mxu0 %v355_v48 }
 0x18f   : > { %v445_v53 = vpop.f32.mrb[0].mxu0 }
 0x190   : > { %v446_v54 = vadd.f32 %v710_v52, %v445_v53  ;;  %v785_v55 = vpop.f32.mrb[1].mxu0 }
 0x192   : > { %v449_v56 = vmax.f32 %v446_v54, 0.0 }
 0x194   : > { %819 = vmatmul.mubr.f32.vlgmr.msra.gmra.mrb[0].mxu1 %v449_v56 }
 0x264   : > { %542 = sbr.rel (%p711_p0) target bundleno = 627 (0x273), region = 60 }
 0x267   : > { %v533_v58 = vpop.f32.mrb[0].mxu1 }
 0x268   : > { %v537_v59 = vadd.f32 %v533_v58, %v450_v57  ;;  %v820_v60 = vpop.f32.mrb[1].mxu1 }
 0x26a   : > { %538 = vst [vmem:[#allocation2] sm:$0xff] %v537_v59 }
 0x271   : > { %v543_v61 = vld [vmem:[#allocation2] sm:$0xff] }
 0x272   : > { %544 = vst [vmem:[%s1537_s18] sm:$0xff] %v543_v61 }
 0x273 PF: > { %s1711_s17 = sld [smem:[#allocation14_spill]]  ;;  %s1712_s4 = sld [smem:[#allocation23_spill]] }
 0x274   : > { %s559_s1 = sshll.u32 %s1537_s18, 4  ;;  %s546_s7 = scalar_lea.sflag [#allocation5], %s1509_s13  ;;  %s560_s1 = int_to_ptr.vmem [resolvable:$true] %s559_s1 }
 0x275   : > { %s1077_s25 = scalar_lea.vmem %s560_s1, 128  ;;  %p1713_p13 = scmp.ne.s32.totalorder %s1697_s5, 0 }
 0x276   : > { %p1078_p3 = scmp.ne.s32.totalorder %s560_s1, %s1077_s25  ;;  %s1214_s24 = smov [#allocation9]  }
 0x277   : > { %s1081_s11 = sshll.u32 %s1214_s24, 4  ;;  %s1082_s11 = int_to_ptr.vmem [resolvable:$false] %s1081_s11 }
 0x278   : > { %p1079_p9 = pnand %p1078_p3, %p1713_p13  ;;  %s1083_s30 = scalar_lea.vmem %s1082_s11, 256 }
 0x279   : > { %s713_s12 = sshll.u32 %s1711_s17, 7  ;;  %p1084_p11 = scmp.lt.s32.totalorder %s560_s1, %s1082_s11 }
 0x27a   : > { %s1603_s9 = scalar_lea.hbm %s1712_s4, %s713_s12  ;;  %p1080_p12 = pneg %p1079_p9 }
 0x27b   : > { %p1085_p2 = scmp.lt.s32.totalorder %s1083_s30, %s1077_s25 }
 0x27d   : > { %p1086_p1 = por %p1085_p2, %p1084_p11 }
 0x27f   : > { %p1087_p5 = pnand %p1086_p1, %p1080_p12 }
 0x281   : > { %1090 = shalt.err (!%p1087_p5)
}
 0x282   : > { %s1091_s13 = scalar_lea.hbm %s1603_s9, 128  ;;  %s1095_s2 = scalar_lea.hbm %s1712_s4, 512 }
 0x283   : > { %p1092_p7 = scmp.ne.s32.totalorder %s1603_s9, %s1091_s13  ;;  %p1096_p10 = scmp.lt.u32.totalorder %s1603_s9, %s1712_s4 }
 0x284   : > { %p1097_p6 = scmp.lt.u32.totalorder %s1095_s2, %s1091_s13  ;;  %p1099_p3 = scmp.lt.u32.totalorder %s1091_s13, %s1603_s9 }
 0x285   : > { %p1093_p8 = pnand %p1092_p7, %p1713_p13 }
 0x286   : > { %p1098_p0 = por %p1097_p6, %p1096_p10 }
 0x287   : > { %p1094_p4 = pneg %p1093_p8 }
 0x288   : > { %p1100_p9 = por %p1099_p3, %p1098_p0 }
 0x28a   : > { %p1101_p12 = pnand %p1100_p9, %p1094_p4 }
 0x28c   : > { %1104 = shalt.err (!%p1101_p12)
}
 0x28d   : > { %875 = dma.vmem_to_hbm [thread:$0]  (%p1713_p13), %s560_s1, 128, %s1603_s9, %s546_s7  }
 0x28e PF: > { %p892_p11 = scmp.ge.s32.totalorder %s1203_s28, 2  ;;  %s571_s16 = sand.u32 1, %s1175_s21  }
 0x28f   : > { %p1714_p2 = scmp.ne.s32.totalorder %s1698_s6, 0  ;;  %s572_s27 = scalar_lea.sflag [#allocation5], %s571_s16 }
 0x291   : > { %p888_p1 = pnand %p892_p11, %p1714_p2 }
 0x293   : > { %1158 = dma.done.wait (!%p888_p1), %s572_s27, 128  }
 0x294   : > { %1160 = vsyncadd (!%p888_p1), %s572_s27, 4294967168  ;;  %s24_s28 = sadd.s32 1, %s1203_s28   ;;  %s1715_s8 = sld [smem:[#allocation18_spill]] }
 0x295   : > { %p21_p5 = scmp.ge.s32.totalorder %s24_s28, 10   ;;  %s1716_s5 = sld [smem:[#allocation13_spill]] }
 0x296   : > { %s1717_s23 = sld [smem:[#allocation19_spill]]  ;;  %s1718_s25 = sld [smem:[#allocation15_spill]] }
 0x297   : > { %s1719_s17 = sld [smem:[#allocation16_spill]]  ;;  %s1720_s27 = sld [smem:[#allocation17_spill]] }
 0x298   : > { %s1721_s18 = smov %s1167_s19  ;;  %s1722_s19 = smov %s1171_s20 }
 0x299   : > { %s1724_s21 = smov %s1179_s22  ;;  %s1726_s24 = smov %s1195_s26 }
 0x29a   : > { %s1723_s20 = smov %s1715_s8  ;;  %23 = sbr.rel (!%p21_p5) target bundleno = 16 (0x10), region = 120 }
 0x29b   : > { %s1725_s22 = smov %s1716_s5 }
 0x29d   : > { %s1727_s26 = smov %s1719_s17 }
 0x2a1   :  { %577 = vsyncpa [#allocation4], 1 }
 0x2a2   :  { %579 = vsyncpa [#allocation4 + $0x1], 1 }
 0x2a3   :  { %580 = vsyncpa [#allocation7], 1 }
 0x2a4   :  { %582 = vsyncpa [#allocation7 + $0x1], 1 }
 0x2a5   :  { %583 = vsyncpa [#allocation5], 1 }
 0x2a6   :  { %585 = vsyncpa [#allocation5 + $0x1], 1 }

</bundles_post_ra>
